<compile_context>
chip_gen: v6e
topology: v6e:2x2x1
jax: 0.10.0
libtpu: 0.0.40
codegen_flags: <defaults>
</compile_context>

<pallas_src>
import jax
import jax.numpy as jnp
from jax.experimental import pallas as pl
from jax.experimental.pallas import tpu as pltpu

HIDDEN = 32
ODIM = 5
ME_DIM = 64
FRONT = 6 + ODIM          # rows of X holding [chunk0..2 | mean_act]
LEAK = 0.01               # nn.LeakyReLU default negative_slope


def _leaky(x):
    # identical to where(x>0, x, 0.01x) for 0 < LEAK < 1, but mul+max (2 VALU ops)
    return jnp.maximum(x, LEAK * x)


def mean_critic_kernel(x_ref, wme_t_ref, bme_t_ref, wc1t_f_ref, wc1t_me_ref,
                       bc1t_ref, wc2t_ref, bc2t_ref, allq_ref):
    # Batch-on-lanes: every activation tile is (rows, TB) with TB on lanes.
    x = x_ref[...]                                   # (F, TB)
    f, tb = x.shape
    n_me = (f - FRONT) // 2                          # obs chunks through mean_embedding

    # ---- mean embedding: VPU broadcast-FMAs (K=2 matmuls are MXU-hostile) ----
    wme_t = wme_t_ref[...]                           # (64, 2)
    w_e = jnp.broadcast_to(wme_t[:, 0:1], (ME_DIM, tb))      # hoisted out of loop
    w_o = jnp.broadcast_to(wme_t[:, 1:2], (ME_DIM, tb))
    bme_b = jnp.broadcast_to(bme_t_ref[...], (ME_DIM, tb))

    acc = jnp.zeros((ME_DIM, tb), jnp.float32)
    # TODO(synk): if state_dim grows to many chunks, switch to
    # lax.fori_loop(..., unroll=True) to bound live ranges; tiny unroll is fine here.
    for j in range(n_me):
        e = x[FRONT + 2 * j: FRONT + 2 * j + 1, :]            # (1, TB)
        o = x[FRONT + 2 * j + 1: FRONT + 2 * j + 2, :]        # (1, TB)
        acc = acc + _leaky(w_e * e + w_o * o + bme_b)
    me_out = acc * (1.0 / n_me)                      # (64, TB)

    # ---- critic: h1 = Wc1ᵀ @ critic_in, done as two M=32 dots with N=TB -------
    # wc1t_f has zero columns over the me-chunk rows, so the whole x block is the
    # RHS of one aligned dot (no unaligned sublane slice of x).
    h1 = (jnp.dot(wc1t_f_ref[...], x, preferred_element_type=jnp.float32)
          + jnp.dot(wc1t_me_ref[...], me_out, preferred_element_type=jnp.float32)
          + bc1t_ref[...])                           # (32, TB)
    h1 = _leaky(h1)
    allq_ref[...] = (jnp.dot(wc2t_ref[...], h1, preferred_element_type=jnp.float32)
                     + bc2t_ref[...])                # (ODIM, TB) lane-dense store


def _pick_batch_tile(batch, f_rows, vmem_budget_bytes=12 << 20):
    """Largest lane tile (multiple of 128 dividing batch, or the full batch) whose
    double-buffered activation + output blocks fit a conservative VMEM budget
    (12 MiB fits the default scoped limit on v5e/v6e/v7x)."""
    pad8 = lambda r: -(-r // 8) * 8
    bytes_per_col = 2 * (pad8(f_rows) + pad8(ODIM)) * 4       # 2 buffers, f32
    cap = max(128, (vmem_budget_bytes // bytes_per_col) // 128 * 128)
    if batch <= cap:
        return batch                                  # block == full dim is always legal
    for tb in range(cap, 127, -128):
        if batch % tb == 0:
            return tb
    return batch


def mean_critic_forward(inps, params, agents=None):
    """inps: list of (state, action) per agent; returns q (B, 1) per requested agent."""
    states = [s for s, a in inps]
    actions = [a for s, a in inps]
    nagents = len(inps)
    agents = list(range(nagents)) if agents is None else list(agents)
    n_sel = len(agents)
    wme, bme, wc1, bc1, wc2, bc2 = params

    B, Ds = states[0].shape
    assert Ds % 2 == 0 and Ds >= 8, "need >=1 obs chunk beyond the first three"
    assert all(s.shape == (B, Ds) for s in states), "fused call needs equal state shapes"
    F = Ds + ODIM

    # Faithful to the torch loop: the i-th *selected* agent uses states[i] /
    # actions[i] for the critic input, excludes actions[i] from the action mean
    # (which is divided by the batch size B, as `mean_act /= len(mean_act)` does),
    # but gathers with actions[agents[i]] (differs only when agents is a subset).
    act_sum = sum(actions)
    xs = []
    for i in range(n_sel):
        s = states[i]
        mean_act = (act_sum - actions[i]) / float(B)
        xs.append(jnp.concatenate([s[:, :6], mean_act, s[:, 6:]], axis=1).T)  # (F, B)
    X = jnp.stack(xs)                                         # (n_sel, F, B)

    # Host-side weight transpose / reorder (once per call, tiny).
    wme_t = wme.T                                             # (64, 2)
    bme_t = bme.reshape(1, ME_DIM).T                          # (64, 1)
    wc1t_f = jnp.concatenate(                                 # (32, F)
        [wc1[:6].T, wc1[6 + ME_DIM:].T,
         jnp.zeros((HIDDEN, Ds - 6), wc1.dtype)], axis=1)
    wc1t_me = wc1[6:6 + ME_DIM].T                             # (32, 64)
    bc1t = bc1.reshape(1, HIDDEN).T                           # (32, 1)
    wc2t = wc2.T                                              # (5, 32)
    bc2t = bc2.reshape(1, ODIM).T                             # (5, 1)

    TB = _pick_batch_tile(B, F)
    grid = (pl.cdiv(B, TB), n_sel)                            # batch tiles lead (v7x balance)

    act_map = lambda b, i: (i, 0, b)
    w_map = lambda b, i: (0, 0)

    all_q = pl.pallas_call(
        mean_critic_kernel,
        grid=grid,
        in_specs=[
            pl.BlockSpec((None, F, TB), act_map),             # fused activations
            pl.BlockSpec((ME_DIM, 2), w_map),                 # wmeᵀ   (VMEM-resident)
            pl.BlockSpec((ME_DIM, 1), w_map),                 # bmeᵀ
            pl.BlockSpec((HIDDEN, F), w_map),                 # wc1ᵀ front (+zero cols)
            pl.BlockSpec((HIDDEN, ME_DIM), w_map),            # wc1ᵀ me_out
            pl.BlockSpec((HIDDEN, 1), w_map),                 # bc1ᵀ
            pl.BlockSpec((ODIM, HIDDEN), w_map),              # wc2ᵀ
            pl.BlockSpec((ODIM, 1), w_map),                   # bc2ᵀ
        ],
        out_specs=pl.BlockSpec((None, ODIM, TB), act_map),
        out_shape=jax.ShapeDtypeStruct((n_sel, ODIM, B), jnp.float32),
        compiler_params=pltpu.CompilerParams(
            dimension_semantics=("parallel", "parallel")),
    )(X, wme_t, bme_t, wc1t_f, wc1t_me, bc1t, wc2t, bc2t)

    # q = all_q gathered at argmax(actions[a_i]) -- one batched argmax + gather.
    # Kept as argmax+gather (not a one-hot contraction) so soft/non-one-hot actions
    # stay exact; jnp.argmax matches torch's first-max tie behaviour.
    A_sel = jnp.stack([actions[a] for a in agents])           # (n_sel, B, ODIM)
    idx = jnp.argmax(A_sel, axis=-1)                          # (n_sel, B)
    q = jnp.take_along_axis(all_q, idx[:, None, :], axis=1)   # (n_sel, 1, B)
    q = jnp.swapaxes(q, 1, 2)                                 # (n_sel, B, 1)
    rets = [q[k] for k in range(n_sel)]
    return rets[0] if len(rets) == 1 else rets


def _reference_forward(inps, params, agents=None):
    """Pure-JAX mirror of the PyTorch forward (validation only)."""
    wme, bme, wc1, bc1, wc2, bc2 = params
    states = [s for s, a in inps]
    actions = [a for s, a in inps]
    nagents = len(inps)
    agents = list(range(nagents)) if agents is None else list(agents)
    leaky = lambda x: jnp.where(x > 0, x, LEAK * x)
    rets = []
    for i, a_i in enumerate(agents):
        s = states[i]
        B, Ds = s.shape
        n_chunks = Ds // 2
        me = [leaky(s[:, 2 * j:2 * j + 2] @ wme + bme) for j in range(3, n_chunks)]
        me_out = sum(me) / len(me)
        other = [actions[j] for j in range(nagents) if j != i]
        mean_act = sum(other) / float(B)
        critic_in = jnp.concatenate([s[:, :6], me_out, mean_act], axis=1)
        h1 = leaky(critic_in @ wc1 + bc1)
        all_q = h1 @ wc2 + bc2
        idx = jnp.argmax(actions[a_i], axis=1)
        rets.append(jnp.take_along_axis(all_q, idx[:, None], axis=1))
    return rets


if __name__ == "__main__":
    key = jax.random.PRNGKey(0)
    nagents = 3
    B = 256               # small; multiple of 128 keeps the lane axis dense
    state_dim = 10        # 5 chunks of 2; mean-embedding over chunks 3 and 4
    act_dim = ODIM        # 5, so 6 + 64 + 5 = 75 critic_fc1 in-features
    hidden_dim = HIDDEN

    keys = iter(jax.random.split(key, 16))
    wme = 0.1 * jax.random.normal(next(keys), (2, ME_DIM), jnp.float32)
    bme = 0.1 * jax.random.normal(next(keys), (1, ME_DIM), jnp.float32)
    wc1 = 0.1 * jax.random.normal(next(keys), (6 + ME_DIM + ODIM, hidden_dim), jnp.float32)
    bc1 = 0.1 * jax.random.normal(next(keys), (1, hidden_dim), jnp.float32)
    wc2 = 0.1 * jax.random.normal(next(keys), (hidden_dim, ODIM), jnp.float32)
    bc2 = 0.1 * jax.random.normal(next(keys), (1, ODIM), jnp.float32)
    params = (wme, bme, wc1, bc1, wc2, bc2)

    inps = []
    for a in range(nagents):
        s = jax.random.normal(next(keys), (B, state_dim), jnp.float32)
        logits = jax.random.normal(next(keys), (B, act_dim), jnp.float32)
        act = jax.nn.one_hot(jnp.argmax(logits, axis=1), act_dim, dtype=jnp.float32)
        inps.append((s, act))

    out = mean_critic_forward(inps, params)
    out = jax.block_until_ready(out)

    ref = _reference_forward(inps, params)
    for o, r in zip(out, ref):
        assert o.shape == (B, 1)
        assert jnp.allclose(o, r, atol=1e-4, rtol=1e-4), (o, r)

    print("KERNEL_OK")
</pallas_src>

<mosaic_0001>
module attributes {stable_mosaic.version = 11 : i64} {
  func.func @mean_critic_kernel(%arg0: i32, %arg1: i32, %arg2: memref<1x15x256xf32, #tpu.memory_space<vmem>>, %arg3: memref<64x2xf32, #tpu.memory_space<vmem>>, %arg4: memref<64x1xf32, #tpu.memory_space<vmem>>, %arg5: memref<32x15xf32, #tpu.memory_space<vmem>>, %arg6: memref<32x64xf32, #tpu.memory_space<vmem>>, %arg7: memref<32x1xf32, #tpu.memory_space<vmem>>, %arg8: memref<5x32xf32, #tpu.memory_space<vmem>>, %arg9: memref<5x1xf32, #tpu.memory_space<vmem>>, %arg10: memref<1x5x256xf32, #tpu.memory_space<vmem>>) attributes {dimension_semantics = [#tpu.dimension_semantics<parallel>, #tpu.dimension_semantics<parallel>], iteration_bounds = array<i64: 1, 3>, scalar_prefetch = 0 : i64, scratch_operands = 0 : i64, tpu.core_type = #tpu.core_type<tc>, window_params = [{transform_indices = @transform_0, window_bounds = array<i64: 1, 15, 256>}, {pipeline_mode = #tpu.pipeline_mode<synchronous>, transform_indices = @transform_1, window_bounds = array<i64: 64, 2>}, {pipeline_mode = #tpu.pipeline_mode<synchronous>, transform_indices = @transform_2, window_bounds = array<i64: 64, 1>}, {pipeline_mode = #tpu.pipeline_mode<synchronous>, transform_indices = @transform_3, window_bounds = array<i64: 32, 15>}, {pipeline_mode = #tpu.pipeline_mode<synchronous>, transform_indices = @transform_4, window_bounds = array<i64: 32, 64>}, {pipeline_mode = #tpu.pipeline_mode<synchronous>, transform_indices = @transform_5, window_bounds = array<i64: 32, 1>}, {pipeline_mode = #tpu.pipeline_mode<synchronous>, transform_indices = @transform_6, window_bounds = array<i64: 5, 32>}, {pipeline_mode = #tpu.pipeline_mode<synchronous>, transform_indices = @transform_7, window_bounds = array<i64: 5, 1>}, {transform_indices = @transform_8, window_bounds = array<i64: 1, 5, 256>}]} {
    %c0 = arith.constant 0 : index
    %c0_0 = arith.constant 0 : index
    %c0_1 = arith.constant 0 : index
    %0 = vector.load %arg2[%c0, %c0_0, %c0_1] : memref<1x15x256xf32, #tpu.memory_space<vmem>>, vector<1x15x256xf32>
    %1 = vector.shape_cast %0 : vector<1x15x256xf32> to vector<15x256xf32>
    %c0_2 = arith.constant 0 : index
    %c0_3 = arith.constant 0 : index
    %2 = vector.load %arg3[%c0_2, %c0_3] : memref<64x2xf32, #tpu.memory_space<vmem>>, vector<64x2xf32>
    %3 = vector.extract_strided_slice %2 {offsets = [0, 0], sizes = [64, 1], strides = [1, 1]} : vector<64x2xf32> to vector<64x1xf32>
    %4 = vector.shape_cast %3 : vector<64x1xf32> to vector<64x1xf32>
    %5 = vector.broadcast %4 : vector<64x1xf32> to vector<64x256xf32>
    %6 = vector.extract_strided_slice %2 {offsets = [0, 1], sizes = [64, 1], strides = [1, 1]} : vector<64x2xf32> to vector<64x1xf32>
    %7 = vector.shape_cast %6 : vector<64x1xf32> to vector<64x1xf32>
    %8 = vector.broadcast %7 : vector<64x1xf32> to vector<64x256xf32>
    %c0_4 = arith.constant 0 : index
    %c0_5 = arith.constant 0 : index
    %9 = vector.load %arg4[%c0_4, %c0_5] : memref<64x1xf32, #tpu.memory_space<vmem>>, vector<64x1xf32>
    %10 = vector.shape_cast %9 : vector<64x1xf32> to vector<64x1xf32>
    %11 = vector.broadcast %10 : vector<64x1xf32> to vector<64x256xf32>
    %cst = arith.constant 0.000000e+00 : f32
    %12 = vector.broadcast %cst : f32 to vector<64x256xf32>
    %13 = vector.extract_strided_slice %1 {offsets = [11, 0], sizes = [1, 256], strides = [1, 1]} : vector<15x256xf32> to vector<1x256xf32>
    %14 = vector.extract_strided_slice %1 {offsets = [12, 0], sizes = [1, 256], strides = [1, 1]} : vector<15x256xf32> to vector<1x256xf32>
    %15 = vector.broadcast %13 : vector<1x256xf32> to vector<64x256xf32>
    %16 = arith.mulf %5, %15 : vector<64x256xf32>
    %17 = vector.broadcast %14 : vector<1x256xf32> to vector<64x256xf32>
    %18 = arith.mulf %8, %17 : vector<64x256xf32>
    %19 = arith.addf %16, %18 : vector<64x256xf32>
    %20 = arith.addf %19, %11 : vector<64x256xf32>
    %cst_6 = arith.constant 0.00999999977 : f32
    %21 = vector.broadcast %cst_6 : f32 to vector<64x256xf32>
    %22 = arith.mulf %21, %20 : vector<64x256xf32>
    %23 = arith.maximumf %20, %22 : vector<64x256xf32>
    %24 = arith.addf %12, %23 : vector<64x256xf32>
    %25 = vector.extract_strided_slice %1 {offsets = [13, 0], sizes = [1, 256], strides = [1, 1]} : vector<15x256xf32> to vector<1x256xf32>
    %26 = vector.extract_strided_slice %1 {offsets = [14, 0], sizes = [1, 256], strides = [1, 1]} : vector<15x256xf32> to vector<1x256xf32>
    %27 = vector.broadcast %25 : vector<1x256xf32> to vector<64x256xf32>
    %28 = arith.mulf %5, %27 : vector<64x256xf32>
    %29 = vector.broadcast %26 : vector<1x256xf32> to vector<64x256xf32>
    %30 = arith.mulf %8, %29 : vector<64x256xf32>
    %31 = arith.addf %28, %30 : vector<64x256xf32>
    %32 = arith.addf %31, %11 : vector<64x256xf32>
    %cst_7 = arith.constant 0.00999999977 : f32
    %33 = vector.broadcast %cst_7 : f32 to vector<64x256xf32>
    %34 = arith.mulf %33, %32 : vector<64x256xf32>
    %35 = arith.maximumf %32, %34 : vector<64x256xf32>
    %36 = arith.addf %24, %35 : vector<64x256xf32>
    %cst_8 = arith.constant 5.000000e-01 : f32
    %37 = vector.broadcast %cst_8 : f32 to vector<64x256xf32>
    %38 = arith.mulf %36, %37 : vector<64x256xf32>
    %c0_9 = arith.constant 0 : index
    %c0_10 = arith.constant 0 : index
    %39 = vector.load %arg5[%c0_9, %c0_10] : memref<32x15xf32, #tpu.memory_space<vmem>>, vector<32x15xf32>
    %cst_11 = arith.constant dense<0.000000e+00> : vector<32x256xf32>
    %40 = tpu.matmul %39, %1, %cst_11 {dimension_numbers = #tpu.dot_dimension_numbers<[1], [0], [0], [1], [0, 0, 1, 1], [], []>} : vector<32x15xf32>, vector<15x256xf32>, vector<32x256xf32> -> vector<32x256xf32>
    %c0_12 = arith.constant 0 : index
    %c0_13 = arith.constant 0 : index
    %41 = vector.load %arg6[%c0_12, %c0_13] : memref<32x64xf32, #tpu.memory_space<vmem>>, vector<32x64xf32>
    %cst_14 = arith.constant dense<0.000000e+00> : vector<32x256xf32>
    %42 = tpu.matmul %41, %38, %cst_14 {dimension_numbers = #tpu.dot_dimension_numbers<[1], [0], [0], [1], [0, 0, 1, 1], [], []>} : vector<32x64xf32>, vector<64x256xf32>, vector<32x256xf32> -> vector<32x256xf32>
    %43 = arith.addf %40, %42 : vector<32x256xf32>
    %c0_15 = arith.constant 0 : index
    %c0_16 = arith.constant 0 : index
    %44 = vector.load %arg7[%c0_15, %c0_16] : memref<32x1xf32, #tpu.memory_space<vmem>>, vector<32x1xf32>
    %45 = vector.broadcast %44 : vector<32x1xf32> to vector<32x256xf32>
    %46 = arith.addf %43, %45 : vector<32x256xf32>
    %cst_17 = arith.constant 0.00999999977 : f32
    %47 = vector.broadcast %cst_17 : f32 to vector<32x256xf32>
    %48 = arith.mulf %47, %46 : vector<32x256xf32>
    %49 = arith.maximumf %46, %48 : vector<32x256xf32>
    %c0_18 = arith.constant 0 : index
    %c0_19 = arith.constant 0 : index
    %50 = vector.load %arg8[%c0_18, %c0_19] : memref<5x32xf32, #tpu.memory_space<vmem>>, vector<5x32xf32>
    %cst_20 = arith.constant dense<0.000000e+00> : vector<5x256xf32>
    %51 = tpu.matmul %50, %49, %cst_20 {dimension_numbers = #tpu.dot_dimension_numbers<[1], [0], [0], [1], [0, 0, 1, 1], [], []>} : vector<5x32xf32>, vector<32x256xf32>, vector<5x256xf32> -> vector<5x256xf32>
    %c0_21 = arith.constant 0 : index
    %c0_22 = arith.constant 0 : index
    %52 = vector.load %arg9[%c0_21, %c0_22] : memref<5x1xf32, #tpu.memory_space<vmem>>, vector<5x1xf32>
    %53 = vector.broadcast %52 : vector<5x1xf32> to vector<5x256xf32>
    %54 = arith.addf %51, %53 : vector<5x256xf32>
    %c0_23 = arith.constant 0 : index
    %c0_24 = arith.constant 0 : index
    %c0_25 = arith.constant 0 : index
    %55 = vector.load %arg10[%c0_23, %c0_24, %c0_25] : memref<1x5x256xf32, #tpu.memory_space<vmem>>, vector<1x5x256xf32>
    %56 = vector.shape_cast %55 : vector<1x5x256xf32> to vector<5x256xf32>
    %57 = vector.shape_cast %54 : vector<5x256xf32> to vector<1x5x256xf32>
    tpu.vector_store %arg10[%c0_23, %c0_24, %c0_25], %57 {strides = array<i32>} : memref<1x5x256xf32, #tpu.memory_space<vmem>>, vector<1x5x256xf32>,
    return
  }
  func.func @transform_0(%arg0: i32, %arg1: i32) -> (i32, i32, i32) {
    %c0_i32 = arith.constant 0 : i32
    %c0_i32_0 = arith.constant 0 : i32
    return %arg1, %c0_i32, %arg0 : i32, i32, i32
  }
  func.func @transform_1(%arg0: i32, %arg1: i32) -> (i32, i32) {
    %c0_i32 = arith.constant 0 : i32
    %c0_i32_0 = arith.constant 0 : i32
    %c0_i32_1 = arith.constant 0 : i32
    return %c0_i32, %c0_i32_0 : i32, i32
  }
  func.func @transform_2(%arg0: i32, %arg1: i32) -> (i32, i32) {
    %c0_i32 = arith.constant 0 : i32
    %c0_i32_0 = arith.constant 0 : i32
    %c0_i32_1 = arith.constant 0 : i32
    return %c0_i32, %c0_i32_0 : i32, i32
  }
  func.func @transform_3(%arg0: i32, %arg1: i32) -> (i32, i32) {
    %c0_i32 = arith.constant 0 : i32
    %c0_i32_0 = arith.constant 0 : i32
    %c0_i32_1 = arith.constant 0 : i32
    return %c0_i32, %c0_i32_0 : i32, i32
  }
  func.func @transform_4(%arg0: i32, %arg1: i32) -> (i32, i32) {
    %c0_i32 = arith.constant 0 : i32
    %c0_i32_0 = arith.constant 0 : i32
    %c0_i32_1 = arith.constant 0 : i32
    return %c0_i32, %c0_i32_0 : i32, i32
  }
  func.func @transform_5(%arg0: i32, %arg1: i32) -> (i32, i32) {
    %c0_i32 = arith.constant 0 : i32
    %c0_i32_0 = arith.constant 0 : i32
    %c0_i32_1 = arith.constant 0 : i32
    return %c0_i32, %c0_i32_0 : i32, i32
  }
  func.func @transform_6(%arg0: i32, %arg1: i32) -> (i32, i32) {
    %c0_i32 = arith.constant 0 : i32
    %c0_i32_0 = arith.constant 0 : i32
    %c0_i32_1 = arith.constant 0 : i32
    return %c0_i32, %c0_i32_0 : i32, i32
  }
  func.func @transform_7(%arg0: i32, %arg1: i32) -> (i32, i32) {
    %c0_i32 = arith.constant 0 : i32
    %c0_i32_0 = arith.constant 0 : i32
    %c0_i32_1 = arith.constant 0 : i32
    return %c0_i32, %c0_i32_0 : i32, i32
  }
  func.func @transform_8(%arg0: i32, %arg1: i32) -> (i32, i32, i32) {
    %c0_i32 = arith.constant 0 : i32
    %c0_i32_0 = arith.constant 0 : i32
    return %arg1, %c0_i32, %arg0 : i32, i32, i32
  }
}

</mosaic_0001>

<bundles_post_ra>
// kernel: tpu_custom_call.1
= control target key start
LH: loop header
LB: loop body
LE: loop exit
PB: predicated region body
PF: predicated region fallthrough
CT: control target
= control target key end

     0   :  { %s1321_s27 = smov 0   ;;  %s1323_s28 = smov 0   ;;  %s1599_s0 = inlined_call_operand.vmem [shape: f32[3,15,256], index: 0, kind: input, shape index: {}]   ;;  %s1600_s1 = inlined_call_operand.vmem [shape: f32[64,2], index: 1, kind: input, shape index: {}]   ;;  %s1601_s2 = inlined_call_operand.vmem [shape: f32[64,1], index: 2, kind: input, shape index: {}]   ;;  %s1602_s3 = inlined_call_operand.vmem [shape: f32[32,15], index: 3, kind: input, shape index: {}]   ;;  %s1603_s4 = inlined_call_operand.vmem [shape: f32[32,64], index: 4, kind: input, shape index: {}]   ;;  %s1604_s5 = inlined_call_operand.vmem [shape: f32[32,1], index: 5, kind: input, shape index: {}]   ;;  %s1605_s6 = inlined_call_operand.vmem [shape: f32[5,32], index: 6, kind: input, shape index: {}]   ;;  %s1606_s7 = inlined_call_operand.vmem [shape: f32[5,1], index: 7, kind: input, shape index: {}]   ;;  %s1607_s8 = inlined_call_operand.vmem [shape: f32[3,5,256], index: 8, kind: output, shape index: {}]  }
   0x1   :  { %s1325_s29 = smov 0  }
   0x2 LB: > { %s27_s30 = sadd.s32 1, %s1267_s28  ;;  %p1191_p0 = scmp.ge.s32.totalorder %s1271_s29, 1  ;;  %s1271_s29 = sphi %s1325_s29, %s18_s29   ;;  %s1267_s28 = sphi %s1323_s28, %s1612_s28   ;;  %s1263_s27 = sphi %s1321_s27, %s1611_s27  }
   0x3   : > { %p28_p1 = scmp.ge.s32.totalorder %s27_s30, 3  ;;  %p283_p2 = scmp.lt.s32.totalorder %s1271_s29, 4 }
   0x5   : > { %s1614_s30 = smov (%p28_p1, %s27_s30), 0  ;;  %p284_p3 = pnand %p1191_p0, %p283_p2 }
   0x6   : > { %p326_p4 = scmp.lt.s32.totalorder (!%p284_p3), %s1263_s27, 2 }
   0x7   : > { %287 = sbr.rel (%p284_p3) target bundleno = 632 (0x278), region = 52 }
   0xc   : > { %v356_v0 = vld [vmem:[%s1600_s1 + $0x38] sm:$0xff]  ;;  %v355_v1 = vld [vmem:[%s1600_s1 + $0x30] sm:$0xff]  ;;  %v1273_v2 = vmov 1   ;;  %v1274_v3 = vmov 0   ;;  %v354_v4 = vld [vmem:[%s1600_s1 + $0x28] sm:$0xff]  ;;  %s1616_s27 = smov (!%p326_p4, %s1263_s27), 2  ;;  %v477_v32 = vlaneseq }
   0xd   : > { %1238 = vset.pattern.permute.xlu0 %v1273_v2  ;;  %1239 = vset.pattern.permute.xlu1 %v1274_v3  ;;  %v351_v5 = vld [vmem:[%s1600_s1 + $0x10] sm:$0xff]  ;;  %v350_v6 = vld [vmem:[%s1600_s1 + $0x8] sm:$0xff]  ;;  %v436_v7 = vld [vmem:[%s1601_s2 + $0x38] sm:$0xff]  ;;  %s1209_s11 = sshll.u32 %s1616_s27, 5  ;;  %vm872_vm0 = vcmask 1046528   ;;  %v1608_v27 = vmov 0.0  }
   0xe   : > { %426 = vperm.xlu0 %1238, %v356_v0   ;;  %389 = vperm.xlu1 %1239, %v355_v1   ;;  %v353_v8 = vld [vmem:[%s1600_s1 + $0x20] sm:$0xff]  ;;  %v435_v9 = vld [vmem:[%s1601_s2 + $0x30] sm:$0xff]  ;;  %v352_v10 = vld [vmem:[%s1600_s1 + $0x18] sm:$0xff]  ;;  %s333_s14 = scalar_lea.vmem %s1599_s0, %s1209_s11  ;;  %vm859_vm1 = vcmask 121856   ;;  %v478_v35 = vshrl.u32 %v477_v32, 7  ;;  %vm757_vm2 = vcmask 523264  }
   0xf   : > { %v434_v11 = vld [vmem:[%s1601_s2 + $0x28] sm:$0xff]  ;;  %v349_v12 = vld [vmem:[%s1600_s1] sm:$0xff]  ;;  %v971_v15 = vld [vmem:[%s1604_s5 + $0x18] sm:$0xff]  ;;  %943 = vmatprep.mubr.f32.mxu1 %v1608_v27  ;;  %834 = vmatprep.mubr.f32.mxu0 %v1608_v27  ;;  %vm1023_vm3 = vcmask 261120   ;;  %s1210_s19 = sshll.u32 %s1616_s27, 4 }
  0x10   : > { %v430_v13 = vld [vmem:[%s1601_s2 + $0x8] sm:$0xff]  ;;  %v433_v14 = vld [vmem:[%s1601_s2 + $0x20] sm:$0xff]  ;;  %v432_v17 = vld [vmem:[%s1601_s2 + $0x18] sm:$0xff]  ;;  %v503_v36 = vsub.s32 4, %v478_v35  ;;  %v631_v37 = vsub.s32 6, %v478_v35  ;;  %v479_v39 = vsub.s32 3, %v478_v35  ;;  %s343_s22 = scalar_lea.vmem %s1607_s8, %s1210_s19 }
  0x11   : > { %v969_v16 = vld [vmem:[%s1604_s5 + $0x8] sm:$0xff]  ;;  %v1017_v18 = vld [vmem:[%s1606_s7] sm:$0x1f]  ;;  %v431_v19 = vld [vmem:[%s1601_s2 + $0x10] sm:$0xff]  ;;  %v607_v40 = vsub.s32 5, %v478_v35 }
  0x12   : > { %1240 = vset.pattern.permute.xlu1 %v1273_v2  ;;  %418 = vperm.xlu0 %1238, %v354_v4   ;;  %v429_v20 = vld [vmem:[%s1601_s2] sm:$0xff]  ;;  %v970_v21 = vld [vmem:[%s1604_s5 + $0x10] sm:$0xff]  ;;  %v348_v22 = vld [vmem:[%s333_s14 + $0x18] sm:$0x7f] }
  0x13   : > { %422 = vperm.xlu1 %1240, %v355_v1   ;;  %v347_v23 = vld [vmem:[%s333_s14 + $0x10] sm:$0x7f]  ;;  %1200 = vmatprep.subr.msk.mxu1 %vm872_vm0, %v348_v22  ;;  %v968_v24 = vld [vmem:[%s1604_s5] sm:$0xff]  ;;  %v346_v25 = vld [vmem:[%s333_s14 + $0x8] sm:$0xff]  ;;  %v1432_v43 = vrot.slane %v348_v22, %v503_v36  ;;  %v1436_v45 = vrot.slane %v348_v22, %v631_v37  ;;  %v1440_v48 = vrot.slane %v348_v22, %v479_v39 }
  0x14   : > { %1201 = vmatpush1.msk.msra.mxu1 %vm872_vm0, %v347_v23  ;;  %v345_v26 = vld [vmem:[%s333_s14] sm:$0xff]  ;;  %v750_v29 = vld [vmem:[%s1602_s3 + $0x8] sm:$0xff]  ;;  %v751_v30 = vld [vmem:[%s1602_s3 + $0x10] sm:$0xff]  ;;  %v1430_v42 = vrot.slane %v347_v23, %v503_v36  ;;  %v1434_v44 = vrot.slane %v347_v23, %v631_v37  ;;  %v1438_v47 = vrot.slane %v347_v23, %v479_v39  ;;  %v1442_v49 = vrot.slane %v347_v23, %v607_v40 }
  0x15   : > { %909 = vmatprep.subr.mxu1 %v346_v25  ;;  %v749_v28 = vld [vmem:[%s1602_s3] sm:$0xff]  ;;  %v752_v31 = vld [vmem:[%s1602_s3 + $0x18] sm:$0xff]  ;;  %v1444_v50 = vrot.slane %v348_v22, %v607_v40 }
  0x16   : > { %406 = vperm.xlu0 %1238, %v351_v5   ;;  %910 = vmatpush1.msra.mxu1 %v345_v26 }
  0x17   : > { %1241 = vset.pattern.permute.xlu1 %v1274_v3  ;;  %1202 = vmatmul.mubr.msk.f32.vlgmr.msra.gmra.mxu1 %vm859_vm1, %v749_v28 }
  0x18   : > { %384 = vperm.xlu1 %1241, %v354_v4   ;;  %949 = vmatprep.mubr.f32.mxu1 %v1608_v27 }
  0x1a   : > { %402 = vperm.xlu0 %1238, %v350_v6  }
  0x1b   : > { %1203 = vmatmul.mubr.msk.f32.gmra.mxu1 %vm859_vm1, %v750_v29 }
  0x1c   : > { %474 = vperm.xlu1 %1241, %v436_v7   ;;  %955 = vmatprep.mubr.f32.mxu1 %v1608_v27 }
  0x1e   : > { %1246 = vset.pattern.permute.xlu0 %v1274_v3 }
  0x1f   : > { %394 = vperm.xlu0 %1246, %v356_v0   ;;  %1204 = vmatmul.mubr.msk.f32.gmra.mxu1 %vm859_vm1, %v751_v30 }
  0x20   : > { %1242 = vset.pattern.permute.xlu1 %v1273_v2  ;;  %961 = vmatprep.mubr.f32.mxu1 %v1608_v27 }
  0x21   : > { %414 = vperm.xlu1 %1242, %v353_v8  }
  0x23   : > { %379 = vperm.xlu0 %1246, %v353_v8   ;;  %1205 = vmatmul.mubr.msk.f32.gmra.mxu1 %vm859_vm1, %v752_v31 }
  0x24   : > { %1091 = vmatprep.mubr.f32.mxu1 %v1608_v27 }
  0x25   : > { %1243 = vset.pattern.permute.xlu1 %v1274_v3 }
  0x26   : > { %469 = vperm.xlu1 %1243, %v435_v9  }
  0x27   : > { %374 = vperm.xlu0 %1246, %v352_v10  }
  0x2a   : > { %1244 = vset.pattern.permute.xlu1 %v1273_v2 }
  0x2b   : > { %410 = vperm.xlu1 %1244, %v352_v10   ;;  %464 = vperm.xlu0 %1246, %v434_v11  }
  0x2f   : > { %1245 = vset.pattern.permute.xlu1 %v1274_v3  ;;  %359 = vperm.xlu0 %1246, %v349_v12  }
  0x30   : > { %369 = vperm.xlu1 %1245, %v351_v5  }
  0x33   : > { %444 = vperm.xlu0 %1246, %v430_v13  }
  0x34   : > { %459 = vperm.xlu1 %1245, %v433_v14  }
  0x37   : > { %989 = vperm.xlu0 %1246, %v971_v15  }
  0x38   : > { %364 = vperm.xlu1 %1245, %v350_v6  }
  0x3b   : > { %979 = vperm.xlu0 %1246, %v969_v16  }
  0x3c   : > { %454 = vperm.xlu1 %1245, %v432_v17  }
  0x3f   : > { %1020 = vperm.xlu0 %1246, %v1017_v18  }
  0x40   : > { %1247 = vset.pattern.permute.xlu1 %v1273_v2 }
  0x41   : > { %398 = vperm.xlu1 %1247, %v349_v12  }
  0x45   : > { %1248 = vset.pattern.permute.xlu1 %v1274_v3 }
  0x46   : > { %449 = vperm.xlu1 %1248, %v431_v19  }
  0x4a   : > { %439 = vperm.xlu1 %1248, %v429_v20  }
  0x4e   : > { %984 = vperm.xlu1 %1248, %v970_v21  }
  0x52   : > { %974 = vperm.xlu1 %1248, %v968_v24  }
  0x89   : > { %v390_v33 = vpop.permute.xlu1 %389  ;;  %v427_v34 = vpop.permute.xlu0 %426 }
  0x8a   : > { %v497_v57 = vmul.f32 %v1438_v47, %v390_v33  ;;  %v498_v58 = vmul.f32 %v1440_v48, %v390_v33  ;;  %v625_v59 = vmul.f32 %v1442_v49, %v390_v33  ;;  %v626_v60 = vmul.f32 %v1444_v50, %v390_v33 }
  0x8b   : > { %v523_v61 = vmul.f32 %v1430_v42, %v427_v34  ;;  %v524_v62 = vmul.f32 %v1432_v43, %v427_v34  ;;  %v651_v63 = vmul.f32 %v1434_v44, %v427_v34  ;;  %v652_v0 = vmul.f32 %v1436_v45, %v427_v34 }
  0x8d   : > { %v419_v38 = vpop.permute.xlu0 %418 }
  0x8e   : > { %v423_v41 = vpop.permute.xlu1 %422  ;;  %v519_v2 = vmul.f32 %v1430_v42, %v419_v38  ;;  %v520_v3 = vmul.f32 %v1432_v43, %v419_v38  ;;  %v647_v4 = vmul.f32 %v1434_v44, %v419_v38  ;;  %v648_v5 = vmul.f32 %v1436_v45, %v419_v38 }
  0x8f   : > { %v521_v52 = vmul.f32 %v1430_v42, %v423_v41  ;;  %v522_v53 = vmul.f32 %v1432_v43, %v423_v41  ;;  %v649_v54 = vmul.f32 %v1434_v44, %v423_v41  ;;  %v650_v55 = vmul.f32 %v1436_v45, %v423_v41 }
  0x91   : > { %v407_v46 = vpop.permute.xlu0 %406  ;;  %v537_v6 = vadd.f32 %v521_v52, %v497_v57  ;;  %v538_v7 = vadd.f32 %v522_v53, %v498_v58  ;;  %v665_v8 = vadd.f32 %v649_v54, %v625_v59  ;;  %v666_v9 = vadd.f32 %v650_v55, %v626_v60 }
  0x92   : > { %v1463_v10 = vmul.f32 %v1430_v42, %v407_v46  ;;  %v1466_v11 = vmul.f32 %v1432_v43, %v407_v46  ;;  %v1475_v19 = vmul.f32 %v1434_v44, %v407_v46  ;;  %v1478_v20 = vmul.f32 %v1436_v45, %v407_v46 }
  0x93   : > { %v385_v51 = vpop.permute.xlu1 %384 }
  0x94   : > { %v495_v12 = vmul.f32 %v1438_v47, %v385_v51  ;;  %v496_v13 = vmul.f32 %v1440_v48, %v385_v51  ;;  %v623_v21 = vmul.f32 %v1442_v49, %v385_v51  ;;  %v624_v22 = vmul.f32 %v1444_v50, %v385_v51 }
  0x95   : > { %v403_v56 = vpop.permute.xlu0 %402 }
  0x96   : > { %v1483_v24 = vmul.f32 %v1430_v42, %v403_v56  ;;  %v1486_v25 = vmul.f32 %v1432_v43, %v403_v56  ;;  %v1489_v26 = vmul.f32 %v1434_v44, %v403_v56  ;;  %v1492_v29 = vmul.f32 %v1436_v45, %v403_v56 }
  0x97   : > { %v475_v1 = vpop.permute.xlu1 %474  ;;  %v535_v36 = vadd.f32 %v519_v2, %v495_v12  ;;  %v536_v37 = vadd.f32 %v520_v3, %v496_v13 }
  0x9a   : > { %v395_v14 = vpop.permute.xlu0 %394 }
  0x9b   : > { %v499_v15 = vmul.f32 %v1438_v47, %v395_v14  ;;  %v500_v16 = vmul.f32 %v1440_v48, %v395_v14  ;;  %v627_v17 = vmul.f32 %v1442_v49, %v395_v14  ;;  %v628_v18 = vmul.f32 %v1444_v50, %v395_v14 }
  0x9c   : > { %v415_v23 = vpop.permute.xlu1 %414 }
  0x9d   : > { %v539_v28 = vadd.f32 %v523_v61, %v499_v15  ;;  %v667_v30 = vadd.f32 %v651_v63, %v627_v17  ;;  %v540_v32 = vadd.f32 %v524_v62, %v500_v16  ;;  %v668_v33 = vadd.f32 %v652_v0, %v628_v18 }
  0x9e   : > { %v380_v31 = vpop.permute.xlu0 %379  ;;  %v517_v34 = vmul.f32 %v1430_v42, %v415_v23  ;;  %v518_v35 = vmul.f32 %v1432_v43, %v415_v23  ;;  %v645_v38 = vmul.f32 %v1434_v44, %v415_v23  ;;  %v646_v60 = vmul.f32 %v1436_v45, %v415_v23 }
  0x9f   : > { %v493_v39 = vmul.f32 %v1438_v47, %v380_v31  ;;  %v494_v40 = vmul.f32 %v1440_v48, %v380_v31  ;;  %v621_v41 = vmul.f32 %v1442_v49, %v380_v31  ;;  %v622_v46 = vmul.f32 %v1444_v50, %v380_v31 }
  0xa0   : > { %v556_v52 = vadd.f32 %v540_v32, %v475_v1  ;;  %v684_v53 = vadd.f32 %v668_v33, %v475_v1  ;;  %v555_v54 = vadd.f32 %v539_v28, %v475_v1  ;;  %v683_v59 = vadd.f32 %v667_v30, %v475_v1 }
  0xa1   : > { %v470_v51 = vpop.permute.xlu1 %469  ;;  %v663_v62 = vadd.f32 %v647_v4, %v623_v21  ;;  %v664_v63 = vadd.f32 %v648_v5, %v624_v22  ;;  %v533_v2 = vadd.f32 %v517_v34, %v493_v39  ;;  %v534_v3 = vadd.f32 %v518_v35, %v494_v40 }
  0xa2   : > { %v1501_v55 = vadd.f32 %v537_v6, %v470_v51  ;;  %v554_v56 = vadd.f32 %v538_v7, %v470_v51  ;;  %v682_v57 = vadd.f32 %v666_v9, %v470_v51  ;;  %v375_v58 = vpop.permute.xlu0 %374  ;;  %v681_v61 = vadd.f32 %v665_v8, %v470_v51 }
  0xa3   : > { %v661_v12 = vadd.f32 %v645_v38, %v621_v41  ;;  %v572_v14 = vmul.f32 0.01, %v556_v52  ;;  %v700_v15 = vmul.f32 0.01, %v684_v53  ;;  %v662_v16 = vadd.f32 %v646_v60, %v622_v46 }
  0xa4   : > { %v569_v0 = vmul.f32 0.01, %v1501_v55  ;;  %v570_v13 = vmul.f32 0.01, %v554_v56  ;;  %v698_v6 = vmul.f32 0.01, %v682_v57  ;;  %v1506_v7 = vmul.f32 %v1438_v47, %v375_v58 }
  0xa5   : > { %v571_v17 = vmul.f32 0.01, %v555_v54  ;;  %v699_v18 = vmul.f32 0.01, %v683_v59  ;;  %v697_v8 = vmul.f32 0.01, %v681_v61  ;;  %v1509_v4 = vmul.f32 %v1440_v48, %v375_v58 }
  0xa6   : > { %v411_v9 = vpop.permute.xlu1 %410  ;;  %v465_v1 = vpop.permute.xlu0 %464  ;;  %v1512_v5 = vmul.f32 %v1442_v49, %v375_v58  ;;  %v1515_v21 = vmul.f32 %v1444_v50, %v375_v58  ;;  %v588_v31 = vmax.f32 %v556_v52, %v572_v14  ;;  %v716_v32 = vmax.f32 %v684_v53, %v700_v15 }
  0xa7   : > { %v551_v22 = vadd.f32 %v535_v36, %v465_v1  ;;  %v552_v23 = vadd.f32 %v536_v37, %v465_v1  ;;  %v679_v28 = vadd.f32 %v663_v62, %v465_v1  ;;  %v680_v30 = vadd.f32 %v664_v63, %v465_v1 }
  0xa8   : > { %v587_v33 = vmax.f32 %v555_v54, %v571_v17  ;;  %v715_v34 = vmax.f32 %v683_v59, %v699_v18  ;;  %v586_v38 = vmax.f32 %v554_v56, %v570_v13  ;;  %v714_v39 = vmax.f32 %v682_v57, %v698_v6 }
  0xa9   : > { %v568_v35 = vmul.f32 0.01, %v552_v23  ;;  %v585_v40 = vmax.f32 %v1501_v55, %v569_v0  ;;  %v567_v41 = vmul.f32 0.01, %v551_v22  ;;  %v695_v46 = vmul.f32 0.01, %v679_v28 }
  0xaa   : > { %v696_v51 = vmul.f32 0.01, %v680_v30  ;;  %v732_v60 = vadd.f32 %v716_v32, %v588_v31  ;;  %v515_v36 = vmul.f32 %v1430_v42, %v411_v9  ;;  %v516_v37 = vmul.f32 %v1432_v43, %v411_v9  ;;  %v360_v53 = vpop.permute.xlu0 %359 }
  0xab   : > { %v1518_v27 = vpop.permute.xlu1 %369  ;;  %v643_v52 = vmul.f32 %v1434_v44, %v411_v9  ;;  %v731_v54 = vadd.f32 %v715_v34, %v587_v33  ;;  %v644_v58 = vmul.f32 %v1436_v45, %v411_v9  ;;  %v1525_v57 = vmul.f32 %v1438_v47, %v360_v53 }
  0xac   : > { %v748_v56 = vmul.f32 0.5, %v732_v60  ;;  %v1528_v55 = vmul.f32 %v1440_v48, %v360_v53  ;;  %v730_v62 = vadd.f32 %v714_v39, %v586_v38  ;;  %v713_v63 = vmax.f32 %v681_v61, %v697_v8 }
  0xad   : > { %v747_v59 = vmul.f32 0.5, %v731_v54  ;;  %v584_v0 = vmax.f32 %v552_v23, %v568_v35  ;;  %v1531_v13 = vmul.f32 %v1442_v49, %v360_v53  ;;  %v712_v15 = vmax.f32 %v680_v30, %v696_v51 }
  0xae   : > { %786 = vmatprep.subr.mxu0 %v748_v56  ;;  %v583_v6 = vmax.f32 %v551_v22, %v567_v41  ;;  %v711_v1 = vmax.f32 %v679_v28, %v695_v46  ;;  %v746_v9 = vmul.f32 0.5, %v730_v62  ;;  %v729_v17 = vadd.f32 %v713_v63, %v585_v40 }
  0xaf   : > { %v460_v14 = vpop.permute.xlu1 %459  ;;  %787 = vmatpush1.msra.mxu0 %v747_v59  ;;  %v728_v34 = vadd.f32 %v712_v15, %v584_v0  ;;  %v1534_v61 = vmul.f32 %v1444_v50, %v360_v53  ;;  %v531_v41 = vadd.f32 %v515_v36, %v1506_v7  ;;  %v532_v54 = vadd.f32 %v516_v37, %v1509_v4 }
  0xb0   : > { %v549_v18 = vadd.f32 %v533_v2, %v460_v14  ;;  %v550_v31 = vadd.f32 %v534_v3, %v460_v14  ;;  %v677_v32 = vadd.f32 %v661_v12, %v460_v14  ;;  %v678_v33 = vadd.f32 %v662_v16, %v460_v14  ;;  %788 = vmatprep.subr.mxu0 %v746_v9 }
  0xb1   : > { %v727_v60 = vadd.f32 %v711_v1, %v583_v6  ;;  %v745_v8 = vmul.f32 0.5, %v729_v17  ;;  %v744_v22 = vmul.f32 0.5, %v728_v34  ;;  %v489_v2 = vmul.f32 %v1438_v47, %v1518_v27 }
  0xb2   : > { %v565_v23 = vmul.f32 0.01, %v549_v18  ;;  %v566_v35 = vmul.f32 0.01, %v550_v31  ;;  %v693_v38 = vmul.f32 0.01, %v677_v32  ;;  %v490_v3 = vmul.f32 %v1440_v48, %v1518_v27 }
  0xb3   : > { %v694_v30 = vmul.f32 0.01, %v678_v33  ;;  %v743_v28 = vmul.f32 0.5, %v727_v60  ;;  %v365_v39 = vpop.permute.xlu1 %364  ;;  %789 = vmatpush1.msra.mxu0 %v745_v8  ;;  %v659_v56 = vadd.f32 %v643_v52, %v1512_v5  ;;  %v660_v59 = vadd.f32 %v644_v58, %v1515_v21  ;;  %v445_v21 = vpop.permute.xlu0 %444 }
  0xb4   : > { %v488_v12 = vmul.f32 %v1440_v48, %v365_v39  ;;  %v616_v16 = vmul.f32 %v1444_v50, %v365_v39  ;;  %790 = vmatprep.subr.mxu0 %v744_v22  ;;  %v487_v40 = vmul.f32 %v1438_v47, %v365_v39  ;;  %v582_v46 = vmax.f32 %v550_v31, %v566_v35 }
  0xb5   : > { %v710_v51 = vmax.f32 %v678_v33, %v694_v30  ;;  %791 = vmatpush1.msra.mxu0 %v743_v28  ;;  %v581_v0 = vmax.f32 %v549_v18, %v565_v23  ;;  %v709_v14 = vmax.f32 %v677_v32, %v693_v38  ;;  %v617_v5 = vmul.f32 %v1442_v49, %v1518_v27 }
  0xb6   : > { %v528_v53 = vadd.f32 %v1486_v25, %v488_v12  ;;  %v656_v48 = vadd.f32 %v1492_v29, %v616_v16  ;;  %v527_v6 = vadd.f32 %v1483_v24, %v487_v40  ;;  %v615_v25 = vmul.f32 %v1442_v49, %v365_v39 }
  0xb7   : > { %v455_v62 = vpop.permute.xlu1 %454  ;;  %v726_v63 = vadd.f32 %v710_v51, %v582_v46  ;;  %v725_v4 = vadd.f32 %v709_v14, %v581_v0  ;;  %v618_v58 = vmul.f32 %v1444_v50, %v1518_v27  ;;  %v529_v35 = vadd.f32 %v1463_v10, %v489_v2 }
  0xb8   : > { %v547_v47 = vadd.f32 %v531_v41, %v455_v62  ;;  %v548_v15 = vadd.f32 %v532_v54, %v455_v62  ;;  %v675_v7 = vadd.f32 %v659_v56, %v455_v62  ;;  %v676_v36 = vadd.f32 %v660_v59, %v455_v62 }
  0xb9   : > { %v742_v1 = vmul.f32 0.5, %v726_v63  ;;  %v741_v17 = vmul.f32 0.5, %v725_v4  ;;  %v544_v18 = vadd.f32 %v528_v53, %v445_v21  ;;  %v672_v34 = vadd.f32 %v656_v48, %v445_v21 }
  0xba   : > { %v563_v37 = vmul.f32 0.01, %v547_v47  ;;  %v564_v29 = vmul.f32 0.01, %v548_v15  ;;  %v691_v52 = vmul.f32 0.01, %v675_v7  ;;  %v655_v60 = vadd.f32 %v1489_v26, %v615_v25 }
  0xbb   : > { %v692_v9 = vmul.f32 0.01, %v676_v36  ;;  %792 = vmatprep.subr.mxu0 %v742_v1  ;;  %v543_v23 = vadd.f32 %v527_v6, %v445_v21  ;;  %v530_v27 = vadd.f32 %v1466_v11, %v490_v3  ;;  %v657_v28 = vadd.f32 %v1475_v19, %v617_v5 }
  0xbc   : > { %v399_v31 = vpop.permute.xlu1 %398  ;;  %v580_v24 = vmax.f32 %v548_v15, %v564_v29  ;;  %v579_v32 = vmax.f32 %v547_v47, %v563_v37  ;;  %v707_v33 = vmax.f32 %v675_v7, %v691_v52  ;;  %793 = vmatpush1.msra.mxu0 %v741_v17  ;;  %v658_v26 = vadd.f32 %v1478_v20, %v618_v58 }
  0xbd   : > { %v509_v49 = vmul.f32 %v1430_v42, %v399_v31  ;;  %v510_v8 = vmul.f32 %v1432_v43, %v399_v31  ;;  %v708_v50 = vmax.f32 %v676_v36, %v692_v9  ;;  %v637_v30 = vmul.f32 %v1434_v44, %v399_v31 }
  0xbe   : > { %v723_v38 = vadd.f32 %v707_v33, %v579_v32  ;;  %v638_v22 = vmul.f32 %v1436_v45, %v399_v31  ;;  %v560_v12 = vmul.f32 0.01, %v544_v18  ;;  %v688_v43 = vmul.f32 0.01, %v672_v34 }
  0xbf   : > { %v724_v39 = vadd.f32 %v708_v50, %v580_v24  ;;  %v525_v42 = vadd.f32 %v509_v49, %v1525_v57  ;;  %v526_v10 = vadd.f32 %v510_v8, %v1528_v55  ;;  %v559_v11 = vmul.f32 0.01, %v543_v23  ;;  %v753_v8 = vld [vmem:[%s1603_s4] sm:$0xff]  ;;  %v756_v50 = vld [vmem:[%s1603_s4 + $0x18] sm:$0xff] }
  0xc0   : > { %v739_v40 = vmul.f32 0.5, %v723_v38  ;;  %v671_v2 = vadd.f32 %v655_v60, %v445_v21  ;;  %v653_v19 = vadd.f32 %v637_v30, %v1531_v13  ;;  %v654_v20 = vadd.f32 %v638_v22, %v1534_v61 }
  0xc1   : > { %v450_v16 = vpop.permute.xlu1 %449  ;;  %v740_v45 = vmul.f32 0.5, %v724_v39  ;;  %v576_v56 = vmax.f32 %v544_v18, %v560_v12  ;;  %v704_v55 = vmax.f32 %v672_v34, %v688_v43  ;;  %v575_v62 = vmax.f32 %v543_v23, %v559_v11 }
  0xc2   : > { %v545_v3 = vadd.f32 %v529_v35, %v450_v16  ;;  %v546_v41 = vadd.f32 %v530_v27, %v450_v16  ;;  %v673_v44 = vadd.f32 %v657_v28, %v450_v16  ;;  %v674_v46 = vadd.f32 %v658_v26, %v450_v16  ;;  %v754_v35 = vld [vmem:[%s1603_s4 + $0x8] sm:$0xff]  ;;  %v755_v27 = vld [vmem:[%s1603_s4 + $0x10] sm:$0xff] }
  0xc3   : > { %v687_v51 = vmul.f32 0.01, %v671_v2  ;;  %794 = vmatprep.subr.mxu0 %v740_v45  ;;  %v720_v37 = vadd.f32 %v704_v55, %v576_v56  ;;  %v1610_v23 = vmov 0.0  }
  0xc4   : > { %v561_v53 = vmul.f32 0.01, %v545_v3  ;;  %v562_v57 = vmul.f32 0.01, %v546_v41  ;;  %v689_v54 = vmul.f32 0.01, %v673_v44  ;;  %795 = vmatpush1.msra.mxu0 %v739_v40 }
  0xc5   : > { %v690_v59 = vmul.f32 0.01, %v674_v46  ;;  %v440_v48 = vpop.permute.xlu1 %439  ;;  %v703_v63 = vmax.f32 %v671_v2, %v687_v51  ;;  %v736_v32 = vmul.f32 0.5, %v720_v37 }
  0xc6   : > { %v541_v0 = vadd.f32 %v525_v42, %v440_v48  ;;  %v542_v14 = vadd.f32 %v526_v10, %v440_v48  ;;  %v669_v47 = vadd.f32 %v653_v19, %v440_v48  ;;  %v670_v15 = vadd.f32 %v654_v20, %v440_v48  ;;  %v990_v10 = vpop.permute.xlu0 %989 }
  0xc7   : > { %v578_v7 = vmax.f32 %v546_v41, %v562_v57  ;;  %v706_v13 = vmax.f32 %v674_v46, %v690_v59  ;;  %v577_v36 = vmax.f32 %v545_v3, %v561_v53  ;;  %v705_v61 = vmax.f32 %v673_v44, %v689_v54 }
  0xc8   : > { %v557_v6 = vmul.f32 0.01, %v541_v0  ;;  %v558_v25 = vmul.f32 0.01, %v542_v14  ;;  %v685_v1 = vmul.f32 0.01, %v669_v47  ;;  %v719_v29 = vadd.f32 %v703_v63, %v575_v62 }
  0xc9   : > { %v686_v4 = vmul.f32 0.01, %v670_v15  ;;  %v722_v5 = vadd.f32 %v706_v13, %v578_v7  ;;  %v721_v21 = vadd.f32 %v705_v61, %v577_v36  ;;  %v985_v41 = vpop.permute.xlu1 %984 }
  0xca   : > { %v574_v52 = vmax.f32 %v542_v14, %v558_v25  ;;  %v573_v58 = vmax.f32 %v541_v0, %v557_v6  ;;  %v701_v9 = vmax.f32 %v669_v47, %v685_v1  ;;  %v735_v34 = vmul.f32 0.5, %v719_v29  ;;  %v980_v48 = vpop.permute.xlu0 %979 }
  0xcb   : > { %v738_v17 = vmul.f32 0.5, %v722_v5  ;;  %v737_v18 = vmul.f32 0.5, %v721_v21  ;;  %v702_v31 = vmax.f32 %v670_v15, %v686_v4 }
  0xcc   : > { %v717_v24 = vadd.f32 %v701_v9, %v573_v58 }
  0xcd   : > { %796 = vmatprep.subr.mxu0 %v738_v17  ;;  %v718_v33 = vadd.f32 %v702_v31, %v574_v52  ;;  %v975_v14 = vpop.permute.xlu1 %974  ;;  %v1016_v31 = vld [vmem:[%s1605_s6] sm:$0x1f] }
  0xce   : > { %797 = vmatpush1.msra.mxu0 %v737_v18  ;;  %v733_v60 = vmul.f32 0.5, %v717_v24  ;;  %v1021_v24 = vpop.permute.xlu0 %1020 }
  0xcf   : > { %798 = vmatprep.subr.mxu0 %v736_v32  ;;  %v734_v49 = vmul.f32 0.5, %v718_v33 }
  0xd0   : > { %799 = vmatpush1.msra.mxu0 %v735_v34 }
  0xd1   : > { %800 = vmatprep.subr.mxu0 %v734_v49 }
  0xd2   : > { %801 = vmatpush1.msra.mxu0 %v733_v60 }
  0xd3   : > { %1196 = vmatmul.mubr.msk.f32.vlgmr.msra.gmra.mxu0 %vm757_vm2, %v753_v8 }
  0xd4   : > { %840 = vmatprep.mubr.f32.mxu0 %v1610_v23 }
  0xd7   : > { %1197 = vmatmul.mubr.msk.f32.gmra.mxu0 %vm757_vm2, %v754_v35  ;;  %v945_v38 = vpop.f32.mrf.mxu1 }
  0xd8   : > { %846 = vmatprep.mubr.f32.mxu0 %v1610_v23 }
  0xd9   : > { %v947_v30 = vpop.f32.mrf.mxu1 }
  0xdb   : > { %1198 = vmatmul.mubr.msk.f32.gmra.mxu0 %vm757_vm2, %v755_v27  ;;  %v951_v22 = vpop.f32.mrf.mxu1 }
  0xdc   : > { %852 = vmatprep.mubr.f32.mxu0 %v1610_v23 }
  0xdd   : > { %v953_v28 = vpop.f32.mrf.mxu1 }
  0xdf   : > { %1199 = vmatmul.mubr.msk.f32.gmra.mxu0 %vm757_vm2, %v756_v50  ;;  %v957_v42 = vpop.f32.mrf.mxu1 }
  0xe1   : > { %v959_v16 = vpop.f32.mrf.mxu1 }
  0xe3   : > { %v963_v2 = vpop.f32.mrf.mxu1 }
  0xe5   : > { %v965_v51 = vpop.f32.mrf.mxu1 }
 0x193   : > { %v836_v26 = vpop.f32.mrf.mxu0 }
 0x194   : > { %v946_v55 = vadd.f32 %v945_v38, %v836_v26 }
 0x195   : > { %v838_v39 = vpop.f32.mrf.mxu0 }
 0x196   : > { %v948_v57 = vadd.f32 %v947_v30, %v838_v39  ;;  %v992_v61 = vadd.f32 %v975_v14, %v946_v55 }
 0x197   : > { %v842_v12 = vpop.f32.mrf.mxu0 }
 0x198   : > { %v952_v20 = vadd.f32 %v951_v22, %v842_v12  ;;  %v993_v7 = vadd.f32 %v975_v14, %v948_v57  ;;  %v1000_v29 = vmul.f32 0.01, %v992_v61 }
 0x199   : > { %v844_v43 = vpop.f32.mrf.mxu0 }
 0x19a   : > { %v954_v45 = vadd.f32 %v953_v28, %v844_v43  ;;  %v994_v47 = vadd.f32 %v980_v48, %v952_v20  ;;  %v1001_v21 = vmul.f32 0.01, %v993_v7  ;;  %v1008_v18 = vmax.f32 %v992_v61, %v1000_v29 }
 0x19b   : > { %v848_v40 = vpop.f32.mrf.mxu0 }
 0x19c   : > { %v958_v44 = vadd.f32 %v957_v42, %v848_v40  ;;  %v995_v63 = vadd.f32 %v980_v48, %v954_v45  ;;  %v1002_v4 = vmul.f32 0.01, %v994_v47  ;;  %v1009_v17 = vmax.f32 %v993_v7, %v1001_v21 }
 0x19d   : > { %v850_v11 = vpop.f32.mrf.mxu0 }
 0x19e   : > { %v960_v3 = vadd.f32 %v959_v16, %v850_v11  ;;  %v996_v62 = vadd.f32 %v985_v41, %v958_v44  ;;  %v1003_v25 = vmul.f32 0.01, %v995_v63  ;;  %v1010_v9 = vmax.f32 %v994_v47, %v1002_v4 }
 0x19f   : > { %v854_v46 = vpop.f32.mrf.mxu0 }
 0x1a0   : > { %v964_v19 = vadd.f32 %v963_v2, %v854_v46  ;;  %v997_v54 = vadd.f32 %v985_v41, %v960_v3  ;;  %v1004_v6 = vmul.f32 0.01, %v996_v62  ;;  %v1011_v58 = vmax.f32 %v995_v63, %v1003_v25 }
 0x1a1   : > { %v856_v53 = vpop.f32.mrf.mxu0 }
 0x1a2   : > { %v998_v56 = vadd.f32 %v990_v10, %v964_v19  ;;  %v966_v59 = vadd.f32 %v965_v51, %v856_v53  ;;  %v1005_v13 = vmul.f32 0.01, %v997_v54  ;;  %v1012_v52 = vmax.f32 %v996_v62, %v1004_v6 }
 0x1a4   : > { %v999_v0 = vadd.f32 %v990_v10, %v966_v59  ;;  %v1006_v15 = vmul.f32 0.01, %v998_v56  ;;  %v1013_v37 = vmax.f32 %v997_v54, %v1005_v13 }
 0x1a6   : > { %v1007_v36 = vmul.f32 0.01, %v999_v0  ;;  %v1014_v5 = vmax.f32 %v998_v56, %v1006_v15 }
 0x1a8   : > { %v1015_v1 = vmax.f32 %v999_v0, %v1007_v36 }
 0x1aa   : > { %1051 = vmatprep.subr.mxu1 %v1015_v1 }
 0x1ab   : > { %1052 = vmatpush1.msra.mxu1 %v1014_v5 }
 0x1ac   : > { %1053 = vmatprep.subr.mxu1 %v1013_v37 }
 0x1ad   : > { %1054 = vmatpush1.msra.mxu1 %v1012_v52 }
 0x1ae   : > { %1055 = vmatprep.subr.mxu1 %v1011_v58 }
 0x1af   : > { %1056 = vmatpush1.msra.mxu1 %v1010_v9 }
 0x1b0   : > { %1057 = vmatprep.subr.mxu1 %v1009_v17 }
 0x1b1   : > { %1058 = vmatpush1.msra.mxu1 %v1008_v18 }
 0x1b2   : > { %1206 = vmatmul.mubr.msk.f32.vlgmr.msra.gmra.mxu1 %vm1023_vm3, %v1016_v31 }
 0x272   : > { %v1093_v32 = vpop.f32.mrf.mxu1 }
 0x273   : > { %v1094_v33 = vadd.f32 %v1093_v32, %v1021_v24 }
 0x274   : > { %v1095_v34 = vpop.f32.mrf.mxu1 }
 0x275   : > { %1098 = vst [vmem:[%s343_s22] sm:$0x1f] %v1094_v33  ;;  %v1096_v60 = vadd.f32 %v1095_v34, %v1021_v24 }
 0x277   : > { %1099 = vst [vmem:[%s343_s22 + $0x8] sm:$0x1f] %v1096_v60 }
 0x278 PF: > { %s18_s29 = sadd.s32 1, %s1271_s29   ;;  %s1611_s27 = smov %s1267_s28 }
 0x279   : > { %p15_p5 = scmp.ge.s32.totalorder %s18_s29, 5   ;;  %s1612_s28 = smov %s1614_s30 }
 0x27b   :  { %17 = sbr.rel (!%p15_p5) target bundleno = 2 (0x2), region = 82 }

</bundles_post_ra>
